<compile_context>
chip_gen: v6e
topology: v6e:2x2x1
jax: 0.10.0
libtpu: 0.0.40
codegen_flags: <defaults>
</compile_context>

<pallas_src>
import functools

import jax
import jax.numpy as jnp
import numpy as np
from jax import lax
from jax.experimental import pallas as pl
from jax.experimental.pallas import tpu as pltpu


def _inner_product_kernel(z_ref, adj_ref, *, tm: int, tn: int):
    """One (TM, TN) tile of sigmoid(z @ z.T); z is fully resident in VMEM."""
    i = pl.program_id(0)
    j = pl.program_id(1)
    # Row tiles for this output block (sublane-aligned dynamic slices of the
    # resident z buffer; tm % 8 == 0 and tn % 128 == 0 by construction).
    zi = z_ref[pl.ds(pl.multiple_of(i * tm, 8), tm), :]          # (TM, D)
    zj = z_ref[pl.ds(pl.multiple_of(j * tn, 8), tn), :]          # (TN, D)
    # NT-form matmul: contract last dims of both operands (no z.T materialized).
    logits = lax.dot_general(
        zi, zj,
        dimension_numbers=(((1,), (1,)), ((), ())),
        preferred_element_type=jnp.float32,
    )                                                            # (TM, TN) MXU
    # sigmoid(x) = 0.5*tanh(0.5*x) + 0.5 -> single EUP op per element.
    adj_ref[...] = (0.5 * jnp.tanh(0.5 * logits) + 0.5).astype(adj_ref.dtype)


def _round_up(x: int, m: int) -> int:
    return ((x + m - 1) // m) * m


def inner_product_decoder(z, *, tm: int | None = None, tn: int | None = None,
                          out_dtype=None):
    """adj_recon = sigmoid(z @ z.T), tiled Pallas TPU kernel."""
    n, d = z.shape
    out_dtype = z.dtype if out_dtype is None else jnp.dtype(out_dtype)

    # Asymmetric, lane-dense tiles; TN (lane/last dim) is the large one.
    # Defaults clamp to the problem size and keep >=2 row tiles when possible
    # so the ("parallel","parallel") grid can shard across v7x's 2 TensorCores.
    if tn is None:
        tn = min(2048, _round_up(n, 128))
    if tm is None:
        tm = min(512, _round_up(max(pl.cdiv(n, 2), 1), 8))
    tm = _round_up(int(tm), 8)
    tn = _round_up(int(tn), 128)

    grid_m = pl.cdiv(n, tm)
    grid_n = pl.cdiv(n, tn)

    # z stays fully resident in VMEM (N*D*4 bytes, tiny next to the N^2
    # output) and is DMA'd once.  Pad its rows so in-kernel pl.ds slices never
    # read out-of-bounds VMEM; the padded (zero) rows only contribute to
    # output elements that Pallas masks off at the ragged edge, so the (N, N)
    # output needs no post-kernel slice.
    n_pad = max(grid_m * tm, grid_n * tn)
    z_in = z if n_pad == n else jnp.pad(z, ((0, n_pad - n), (0, 0)))

    kernel = functools.partial(_inner_product_kernel, tm=tm, tn=tn)

    return pl.pallas_call(
        kernel,
        out_shape=jax.ShapeDtypeStruct((n, n), out_dtype),
        grid_spec=pltpu.PrefetchScalarGridSpec(
            num_scalar_prefetch=0,
            grid=(grid_m, grid_n),
            in_specs=[
                # Whole z resident; constant block index -> fetched once.
                pl.BlockSpec((n_pad, d), lambda i, j: (0, 0)),
            ],
            out_specs=pl.BlockSpec((tm, tn), lambda i, j: (i, j)),
        ),
        compiler_params=pltpu.CompilerParams(
            dimension_semantics=("parallel", "parallel"),
        ),
        cost_estimate=pl.CostEstimate(
            flops=2 * n * n * d,
            transcendentals=n * n,
            bytes_accessed=out_dtype.itemsize * n * n + z.dtype.itemsize * n * d,
        ),
    )(z_in)


if __name__ == "__main__":
    key = jax.random.PRNGKey(0)
    latent_dim = 32

    test_cases = [
        # (num_nodes, tile overrides) -- small, module-consistent shapes.
        (256, dict(tm=128, tn=256)),   # tile-aligned, 2x1 grid (tiled path)
        (200, dict()),                 # ragged N: masked edge output blocks
    ]

    for num_nodes, tiles in test_cases:
        z = jax.random.normal(key, (num_nodes, latent_dim), dtype=jnp.float32)

        adj = jax.block_until_ready(inner_product_decoder(z, **tiles))

        # Pure-JAX reference check of the forward pass.
        adj_ref = jax.nn.sigmoid(z @ z.T)
        np.testing.assert_allclose(np.asarray(adj), np.asarray(adj_ref),
                                   rtol=1e-5, atol=1e-5)

    print("KERNEL_OK")
</pallas_src>

<mosaic_0001>
module attributes {stable_mosaic.version = 11 : i64} {
  func.func @_inner_product_kernel(%arg0: i32, %arg1: i32, %arg2: memref<256x32xf32, #tpu.memory_space<vmem>>, %arg3: memref<128x256xf32, #tpu.memory_space<vmem>>) attributes {dimension_semantics = [#tpu.dimension_semantics<parallel>, #tpu.dimension_semantics<parallel>], iteration_bounds = array<i64: 2, 1>, scalar_prefetch = 0 : i64, scratch_operands = 0 : i64, tpu.core_type = #tpu.core_type<tc>, window_params = [{pipeline_mode = #tpu.pipeline_mode<synchronous>, transform_indices = @transform_0, window_bounds = array<i64: 256, 32>}, {transform_indices = @transform_1, window_bounds = array<i64: 128, 256>}]} {
    %c128_i32 = arith.constant 128 : i32
    %0 = arith.muli %arg0, %c128_i32 : i32
    %1 = tpu.assume_multiple %0, 8 : i32
    %2 = arith.index_cast %1 : i32 to index
    %c0 = arith.constant 0 : index
    %3 = vector.load %arg2[%2, %c0] : memref<256x32xf32, #tpu.memory_space<vmem>>, vector<128x32xf32>
    %c256_i32 = arith.constant 256 : i32
    %4 = arith.muli %arg1, %c256_i32 : i32
    %5 = tpu.assume_multiple %4, 8 : i32
    %6 = arith.index_cast %5 : i32 to index
    %c0_0 = arith.constant 0 : index
    %7 = vector.load %arg2[%6, %c0_0] : memref<256x32xf32, #tpu.memory_space<vmem>>, vector<256x32xf32>
    %cst = arith.constant dense<0.000000e+00> : vector<128x256xf32>
    %8 = tpu.matmul %3, %7, %cst {dimension_numbers = #tpu.dot_dimension_numbers<[1], [1], [0], [0], [0, 0, 1, 0], [], []>} : vector<128x32xf32>, vector<256x32xf32>, vector<128x256xf32> -> vector<128x256xf32>
    %cst_1 = arith.constant 5.000000e-01 : f32
    %9 = vector.broadcast %cst_1 : f32 to vector<128x256xf32>
    %10 = arith.mulf %9, %8 : vector<128x256xf32>
    %11 = math.tanh %10 : vector<128x256xf32>
    %cst_2 = arith.constant 5.000000e-01 : f32
    %12 = vector.broadcast %cst_2 : f32 to vector<128x256xf32>
    %13 = arith.mulf %12, %11 : vector<128x256xf32>
    %cst_3 = arith.constant 5.000000e-01 : f32
    %14 = vector.broadcast %cst_3 : f32 to vector<128x256xf32>
    %15 = arith.addf %13, %14 : vector<128x256xf32>
    %c0_4 = arith.constant 0 : index
    %c0_5 = arith.constant 0 : index
    %16 = vector.load %arg3[%c0_4, %c0_5] : memref<128x256xf32, #tpu.memory_space<vmem>>, vector<128x256xf32>
    tpu.vector_store %arg3[%c0_4, %c0_5], %15 {strides = array<i32>} : memref<128x256xf32, #tpu.memory_space<vmem>>, vector<128x256xf32>,
    return
  }
  func.func @transform_0(%arg0: i32, %arg1: i32) -> (i32, i32) {
    %c0_i32 = arith.constant 0 : i32
    %c0_i32_0 = arith.constant 0 : i32
    %c0_i32_1 = arith.constant 0 : i32
    return %c0_i32, %c0_i32_0 : i32, i32
  }
  func.func @transform_1(%arg0: i32, %arg1: i32) -> (i32, i32) {
    %c0_i32 = arith.constant 0 : i32
    return %arg0, %arg1 : i32, i32
  }
}

</mosaic_0001>

<bundles_post_ra>
// kernel: tpu_custom_call.1
= control target key start
LH: loop header
LB: loop body
LE: loop exit
PB: predicated region body
PF: predicated region fallthrough
CT: control target
= control target key end

     0   :  { %6 = vsyncpa [#allocation3], 0  ;;  %s1454_s0 = inlined_call_operand.vmem [shape: f32[256,32], index: 0, kind: input, shape index: {}]   ;;  %s1455_s1 = inlined_call_operand.hbm [shape: f32[256,256], index: 1, kind: output, shape index: {}]  }
   0x1   :  { %8 = vsyncpa [#allocation3 + $0x1], 0  ;;  %s1081_s6 = smov 0   ;;  %s1083_s7 = smov 0  }
   0x2   :  { %s1085_s8 = smov 0   ;;  %s1087_s9 = smov 0  }
   0x3   :  { %s1089_s10 = smov 0   ;;  %s1091_s11 = smov 0  }
   0x4 LB: > { %s711_s12 = sadd.s32 4294967295, %s1066_s11   ;;  %s712_s13 = sadd.s32 4294967294, %s1066_s11   ;;  %s1066_s11 = sphi %s1091_s11, %s14_s11   ;;  %s1062_s10 = sphi %s1089_s10, %s1462_s10   ;;  %s1058_s9 = sphi %s1087_s9, %s1461_s9   ;;  %s1054_s8 = sphi %s1085_s8, %s1460_s8   ;;  %s1050_s7 = sphi %s1083_s7, %s1459_s7   ;;  %s1046_s6 = sphi %s1081_s6, %s1458_s6  }
   0x5   : > { %s26_s14 = sadd.s32 1, %s1062_s10  ;;  %s56_s15 = sadd.s32 1, %s1054_s8 }
   0x6   : > { %p28_p0 = scmp.ge.s32.totalorder %s26_s14, 2  ;;  %p66_p1 = scmp.ne.s32.totalorder %s1054_s8, %s1050_s7 }
   0x7   : > { %p67_p2 = scmp.eq.s32.totalorder %s711_s12, 1  ;;  %p72_p3 = scmp.ne.s32.totalorder %s1050_s7, %s1046_s6 }
   0x8   : > { %s1464_s14 = smov (%p28_p0, %s26_s14), 0  ;;  %p73_p5 = scmp.eq.s32.totalorder %s712_s13, 1 }
   0x9   : > { %p1121_p4 = por %p67_p2, %p66_p1  ;;  %s51_s17 = ssub.s32 %s1062_s10, %s1464_s14 }
   0xa   : > { %p714_p6 = scmp.ge.s32.totalorder %s1066_s11, 1  ;;  %p54_p7 = scmp.eq.s32.totalorder %s51_s17, 0 }
   0xb   : > { %p1128_p8 = por %p73_p5, %p72_p3  ;;  %p94_p9 = scmp.lt.s32.totalorder %s1066_s11, 3 }
   0xc   : > { %s1134_s19 = scalar_select %p54_p7, %s1054_s8, %s56_s15  }
   0xd   : > { %p95_p10 = pnand %p714_p6, %p94_p9 }
   0xe   : > { %s716_s30 = sshll.u32 (!%p95_p10), %s1058_s9, 7  ;;  %s772_s13 = sshll.u32 (!%p95_p10), %s1058_s9, 12 }
   0xf   : > { %98 = sbr.rel (%p95_p10) target bundleno = 343 (0x157), region = 24  ;;  %s1168_s12 = scalar_lea.vmem (!%p95_p10), %s1454_s0, %s716_s30 }
  0x10   : > { %s1400_s21 = scalar_lea.hbm (!%p95_p10), %s1455_s1, %s772_s13  ;;  %s1068_s23 = smov (!%p95_p10), [#allocation2]  }
  0x11   : > { %s994_s24 = sshll.u32 (!%p95_p10), %s1068_s23, 4  ;;  %s995_s24 = int_to_ptr.vmem [resolvable:$false] %s994_s24 }
  0x12   : > { %s996_s25 = scalar_lea.vmem (!%p95_p10), %s995_s24, 8192 }
  0x14   : > { %v162_v0 = vld [vmem:[%s1454_s0 + $0xf8] sm:$0xff]  ;;  %vm163_vm0 = vcmask 261120   ;;  %v161_v2 = vld [vmem:[%s1454_s0 + $0xf0] sm:$0xff]  ;;  %v160_v4 = vld [vmem:[%s1454_s0 + $0xe8] sm:$0xff] }
  0x15   : > { %v146_v1 = vld [vmem:[%s1454_s0 + $0x78] sm:$0xff]  ;;  %773 = vmatprep.subr.msk.mxu0 %vm163_vm0, %v162_v0  ;;  %837 = vmatprep.subr.msk.mxu1 %vm163_vm0, %v162_v0  ;;  %v145_v3 = vld [vmem:[%s1454_s0 + $0x70] sm:$0xff]  ;;  %v144_v5 = vld [vmem:[%s1454_s0 + $0x68] sm:$0xff] }
  0x16   : > { %774 = vmatpush3.xpose.msk.msra.mxu0 %vm163_vm0, %v146_v1  ;;  %853 = vmatpush3.xpose.msk.msra.mxu1 %vm163_vm0, %v146_v1  ;;  %v159_v6 = vld [vmem:[%s1454_s0 + $0xe0] sm:$0xff]  ;;  %v158_v10 = vld [vmem:[%s1454_s0 + $0xd8] sm:$0xff]  ;;  %v157_v12 = vld [vmem:[%s1454_s0 + $0xd0] sm:$0xff] }
  0x17   : > { %775 = vmatprep.subr.msk.mxu0 %vm163_vm0, %v161_v2  ;;  %838 = vmatprep.subr.msk.mxu1 %vm163_vm0, %v161_v2  ;;  %v1176_v7 = vld [vmem:[%s1168_s12] sm:$0xff]  ;;  %v142_v11 = vld [vmem:[%s1454_s0 + $0x58] sm:$0xff]  ;;  %v141_v13 = vld [vmem:[%s1454_s0 + $0x50] sm:$0xff] }
  0x18   : > { %v143_v8 = vld [vmem:[%s1454_s0 + $0x60] sm:$0xff]  ;;  %805 = vmatprep.mubr.msk.f32.mxu0 %vm163_vm0, %v1176_v7  ;;  %v156_v14 = vld [vmem:[%s1454_s0 + $0xc8] sm:$0xff]  ;;  %v154_v18 = vld [vmem:[%s1454_s0 + $0xb8] sm:$0xff] }
  0x19   : > { %v1184_v9 = vld [vmem:[%s1168_s12 + $0x40] sm:$0xff]  ;;  %v140_v15 = vld [vmem:[%s1454_s0 + $0x48] sm:$0xff]  ;;  %v138_v19 = vld [vmem:[%s1454_s0 + $0x38] sm:$0xff] }
  0x1a   : > { %776 = vmatpush3.xpose.msk.msra.mxu0 %vm163_vm0, %v145_v3  ;;  %854 = vmatpush3.xpose.msk.msra.mxu1 %vm163_vm0, %v145_v3  ;;  %v155_v16 = vld [vmem:[%s1454_s0 + $0xc0] sm:$0xff]  ;;  %v153_v20 = vld [vmem:[%s1454_s0 + $0xb0] sm:$0xff]  ;;  %v152_v22 = vld [vmem:[%s1454_s0 + $0xa8] sm:$0xff] }
  0x1b   : > { %777 = vmatprep.subr.msk.mxu0 %vm163_vm0, %v160_v4  ;;  %839 = vmatprep.subr.msk.mxu1 %vm163_vm0, %v160_v4  ;;  %v139_v17 = vld [vmem:[%s1454_s0 + $0x40] sm:$0xff]  ;;  %v137_v21 = vld [vmem:[%s1454_s0 + $0x30] sm:$0xff]  ;;  %v136_v23 = vld [vmem:[%s1454_s0 + $0x28] sm:$0xff] }
  0x1c   : > { %821 = vmatprep.mubr.msk.f32.mxu1 %vm163_vm0, %v1184_v9  ;;  %v151_v24 = vld [vmem:[%s1454_s0 + $0xa0] sm:$0xff]  ;;  %v150_v26 = vld [vmem:[%s1454_s0 + $0x98] sm:$0xff]  ;;  %v149_v28 = vld [vmem:[%s1454_s0 + $0x90] sm:$0xff] }
  0x1d   : > { %v135_v25 = vld [vmem:[%s1454_s0 + $0x20] sm:$0xff]  ;;  %v134_v27 = vld [vmem:[%s1454_s0 + $0x18] sm:$0xff]  ;;  %v133_v29 = vld [vmem:[%s1454_s0 + $0x10] sm:$0xff] }
  0x1e   : > { %778 = vmatpush3.xpose.msk.msra.mxu0 %vm163_vm0, %v144_v5  ;;  %855 = vmatpush3.xpose.msk.msra.mxu1 %vm163_vm0, %v144_v5  ;;  %v148_v30 = vld [vmem:[%s1454_s0 + $0x88] sm:$0xff]  ;;  %v147_v32 = vld [vmem:[%s1454_s0 + $0x80] sm:$0xff]  ;;  %v115_v36 = vld [vmem:[%s1168_s12 + $0x10] sm:$0xff] }
  0x1f   : > { %779 = vmatprep.subr.msk.mxu0 %vm163_vm0, %v159_v6  ;;  %840 = vmatprep.subr.msk.mxu1 %vm163_vm0, %v159_v6  ;;  %v132_v31 = vld [vmem:[%s1454_s0 + $0x8] sm:$0xff]  ;;  %v131_v33 = vld [vmem:[%s1454_s0] sm:$0xff]  ;;  %v123_v37 = vld [vmem:[%s1168_s12 + $0x50] sm:$0xff] }
  0x20   : > { %v114_v34 = vld [vmem:[%s1168_s12 + $0x8] sm:$0xff]  ;;  %v116_v38 = vld [vmem:[%s1168_s12 + $0x18] sm:$0xff]  ;;  %v117_v40 = vld [vmem:[%s1168_s12 + $0x20] sm:$0xff] }
  0x21   : > { %v122_v35 = vld [vmem:[%s1168_s12 + $0x48] sm:$0xff]  ;;  %v124_v39 = vld [vmem:[%s1168_s12 + $0x58] sm:$0xff]  ;;  %v125_v41 = vld [vmem:[%s1168_s12 + $0x60] sm:$0xff] }
  0x22   : > { %780 = vmatpush3.xpose.msk.msra.mxu0 %vm163_vm0, %v143_v8  ;;  %856 = vmatpush3.xpose.msk.msra.mxu1 %vm163_vm0, %v143_v8  ;;  %v118_v42 = vld [vmem:[%s1168_s12 + $0x28] sm:$0xff]  ;;  %v119_v44 = vld [vmem:[%s1168_s12 + $0x30] sm:$0xff]  ;;  %v120_v46 = vld [vmem:[%s1168_s12 + $0x38] sm:$0xff] }
  0x23   : > { %781 = vmatprep.subr.msk.mxu0 %vm163_vm0, %v158_v10  ;;  %841 = vmatprep.subr.msk.mxu1 %vm163_vm0, %v158_v10  ;;  %v126_v43 = vld [vmem:[%s1168_s12 + $0x68] sm:$0xff]  ;;  %v127_v45 = vld [vmem:[%s1168_s12 + $0x70] sm:$0xff]  ;;  %v128_v47 = vld [vmem:[%s1168_s12 + $0x78] sm:$0xff]  ;;  %s106_s12 = sand.u32 1, %s1050_s7  }
  0x24   : > { %s1361_s4 = sshll.u32 %s106_s12, 8  ;;  %s1409_s9 = scalar_lea.sflag [#allocation3], %s106_s12 }
  0x25   : > { %s1364_s5 = scalar_lea.vmem [#allocation2], %s1361_s4 }
  0x26   : > { %782 = vmatpush3.xpose.msk.msra.mxu0 %vm163_vm0, %v142_v11  ;;  %857 = vmatpush3.xpose.msk.msra.mxu1 %vm163_vm0, %v142_v11  ;;  %s646_s15 = sshll.u32 %s1364_s5, 4  ;;  %s1402_s15 = int_to_ptr.vmem [resolvable:$true] %s646_s15 }
  0x27   : > { %783 = vmatprep.subr.msk.mxu0 %vm163_vm0, %v157_v12  ;;  %842 = vmatprep.subr.msk.mxu1 %vm163_vm0, %v157_v12  ;;  %s990_s22 = scalar_lea.vmem %s1402_s15, 4096  ;;  %p997_p0 = scmp.lt.s32.totalorder %s1402_s15, %s995_s24 }
  0x28   : > { %p991_p11 = scmp.ne.s32.totalorder %s1402_s15, %s990_s22  ;;  %p998_p1 = scmp.lt.s32.totalorder %s996_s25, %s990_s22 }
  0x2a   : > { %784 = vmatpush3.xpose.msk.msra.mxu0 %vm163_vm0, %v141_v13  ;;  %858 = vmatpush3.xpose.msk.msra.mxu1 %vm163_vm0, %v141_v13  ;;  %p992_p12 = pnand %p991_p11, %p1121_p4  ;;  %p999_p2 = por %p998_p1, %p997_p0 }
  0x2b   : > { %785 = vmatprep.subr.msk.mxu0 %vm163_vm0, %v156_v14  ;;  %843 = vmatprep.subr.msk.mxu1 %vm163_vm0, %v156_v14 }
  0x2c   : > { %p993_p13 = pneg %p992_p12 }
  0x2e   : > { %786 = vmatpush3.xpose.msk.msra.mxu0 %vm163_vm0, %v140_v15  ;;  %859 = vmatpush3.xpose.msk.msra.mxu1 %vm163_vm0, %v140_v15  ;;  %p1000_p3 = pnand %p999_p2, %p993_p13 }
  0x2f   : > { %787 = vmatprep.subr.msk.mxu0 %vm163_vm0, %v155_v16  ;;  %844 = vmatprep.subr.msk.mxu1 %vm163_vm0, %v155_v16 }
  0x32   : > { %788 = vmatpush3.xpose.msk.msra.mxu0 %vm163_vm0, %v139_v17  ;;  %860 = vmatpush3.xpose.msk.msra.mxu1 %vm163_vm0, %v139_v17 }
  0x33   : > { %789 = vmatprep.subr.msk.mxu0 %vm163_vm0, %v154_v18  ;;  %845 = vmatprep.subr.msk.mxu1 %vm163_vm0, %v154_v18 }
  0x36   : > { %790 = vmatpush3.xpose.msk.msra.mxu0 %vm163_vm0, %v138_v19  ;;  %861 = vmatpush3.xpose.msk.msra.mxu1 %vm163_vm0, %v138_v19 }
  0x37   : > { %791 = vmatprep.subr.msk.mxu0 %vm163_vm0, %v153_v20  ;;  %846 = vmatprep.subr.msk.mxu1 %vm163_vm0, %v153_v20 }
  0x3a   : > { %792 = vmatpush3.xpose.msk.msra.mxu0 %vm163_vm0, %v137_v21  ;;  %862 = vmatpush3.xpose.msk.msra.mxu1 %vm163_vm0, %v137_v21 }
  0x3b   : > { %793 = vmatprep.subr.msk.mxu0 %vm163_vm0, %v152_v22  ;;  %847 = vmatprep.subr.msk.mxu1 %vm163_vm0, %v152_v22 }
  0x3e   : > { %794 = vmatpush3.xpose.msk.msra.mxu0 %vm163_vm0, %v136_v23  ;;  %863 = vmatpush3.xpose.msk.msra.mxu1 %vm163_vm0, %v136_v23 }
  0x3f   : > { %795 = vmatprep.subr.msk.mxu0 %vm163_vm0, %v151_v24  ;;  %848 = vmatprep.subr.msk.mxu1 %vm163_vm0, %v151_v24 }
  0x42   : > { %796 = vmatpush3.xpose.msk.msra.mxu0 %vm163_vm0, %v135_v25  ;;  %864 = vmatpush3.xpose.msk.msra.mxu1 %vm163_vm0, %v135_v25 }
  0x43   : > { %797 = vmatprep.subr.msk.mxu0 %vm163_vm0, %v150_v26  ;;  %849 = vmatprep.subr.msk.mxu1 %vm163_vm0, %v150_v26 }
  0x46   : > { %798 = vmatpush3.xpose.msk.msra.mxu0 %vm163_vm0, %v134_v27  ;;  %865 = vmatpush3.xpose.msk.msra.mxu1 %vm163_vm0, %v134_v27 }
  0x47   : > { %799 = vmatprep.subr.msk.mxu0 %vm163_vm0, %v149_v28  ;;  %850 = vmatprep.subr.msk.mxu1 %vm163_vm0, %v149_v28 }
  0x4a   : > { %800 = vmatpush3.xpose.msk.msra.mxu0 %vm163_vm0, %v133_v29  ;;  %866 = vmatpush3.xpose.msk.msra.mxu1 %vm163_vm0, %v133_v29 }
  0x4b   : > { %801 = vmatprep.subr.msk.mxu0 %vm163_vm0, %v148_v30  ;;  %851 = vmatprep.subr.msk.mxu1 %vm163_vm0, %v148_v30 }
  0x4e   : > { %802 = vmatpush3.xpose.msk.msra.mxu0 %vm163_vm0, %v132_v31  ;;  %867 = vmatpush3.xpose.msk.msra.mxu1 %vm163_vm0, %v132_v31 }
  0x4f   : > { %803 = vmatprep.subr.msk.mxu0 %vm163_vm0, %v147_v32  ;;  %852 = vmatprep.subr.msk.mxu1 %vm163_vm0, %v147_v32 }
  0x52   : > { %804 = vmatpush3.xpose.msk.msra.mxu0 %vm163_vm0, %v131_v33  ;;  %868 = vmatpush3.xpose.msk.msra.mxu1 %vm163_vm0, %v131_v33 }
  0x55   : > { %806 = vmatmul.mubr.msk.f32.vlgmr.msra.gmra.mxu0 %vm163_vm0, %v1176_v7  ;;  %822 = vmatmul.mubr.msk.f32.vlgmr.msra.gmra.mxu1 %vm163_vm0, %v1184_v9 }
  0x56   : > { %807 = vmatprep.mubr.msk.f32.mxu0 %vm163_vm0, %v114_v34  ;;  %823 = vmatprep.mubr.msk.f32.mxu1 %vm163_vm0, %v122_v35 }
  0x59   : > { %808 = vmatmul.mubr.msk.f32.gmra.mxu0 %vm163_vm0, %v114_v34  ;;  %824 = vmatmul.mubr.msk.f32.gmra.mxu1 %vm163_vm0, %v122_v35 }
  0x5a   : > { %809 = vmatprep.mubr.msk.f32.mxu0 %vm163_vm0, %v115_v36  ;;  %825 = vmatprep.mubr.msk.f32.mxu1 %vm163_vm0, %v123_v37 }
  0x5d   : > { %810 = vmatmul.mubr.msk.f32.gmra.mxu0 %vm163_vm0, %v115_v36  ;;  %826 = vmatmul.mubr.msk.f32.gmra.mxu1 %vm163_vm0, %v123_v37 }
  0x5e   : > { %811 = vmatprep.mubr.msk.f32.mxu0 %vm163_vm0, %v116_v38  ;;  %827 = vmatprep.mubr.msk.f32.mxu1 %vm163_vm0, %v124_v39 }
  0x61   : > { %812 = vmatmul.mubr.msk.f32.gmra.mxu0 %vm163_vm0, %v116_v38  ;;  %828 = vmatmul.mubr.msk.f32.gmra.mxu1 %vm163_vm0, %v124_v39 }
  0x62   : > { %813 = vmatprep.mubr.msk.f32.mxu0 %vm163_vm0, %v117_v40  ;;  %829 = vmatprep.mubr.msk.f32.mxu1 %vm163_vm0, %v125_v41 }
  0x65   : > { %814 = vmatmul.mubr.msk.f32.gmra.mxu0 %vm163_vm0, %v117_v40  ;;  %830 = vmatmul.mubr.msk.f32.gmra.mxu1 %vm163_vm0, %v125_v41 }
  0x66   : > { %815 = vmatprep.mubr.msk.f32.mxu0 %vm163_vm0, %v118_v42  ;;  %831 = vmatprep.mubr.msk.f32.mxu1 %vm163_vm0, %v126_v43 }
  0x69   : > { %816 = vmatmul.mubr.msk.f32.gmra.mxu0 %vm163_vm0, %v118_v42  ;;  %832 = vmatmul.mubr.msk.f32.gmra.mxu1 %vm163_vm0, %v126_v43 }
  0x6a   : > { %817 = vmatprep.mubr.msk.f32.mxu0 %vm163_vm0, %v119_v44  ;;  %833 = vmatprep.mubr.msk.f32.mxu1 %vm163_vm0, %v127_v45 }
  0x6d   : > { %818 = vmatmul.mubr.msk.f32.gmra.mxu0 %vm163_vm0, %v119_v44  ;;  %834 = vmatmul.mubr.msk.f32.gmra.mxu1 %vm163_vm0, %v127_v45 }
  0x6e   : > { %819 = vmatprep.mubr.msk.f32.mxu0 %vm163_vm0, %v120_v46  ;;  %835 = vmatprep.mubr.msk.f32.mxu1 %vm163_vm0, %v128_v47 }
  0x71   : > { %820 = vmatmul.mubr.msk.f32.gmra.mxu0 %vm163_vm0, %v120_v46  ;;  %836 = vmatmul.mubr.msk.f32.gmra.mxu1 %vm163_vm0, %v128_v47 }
 0x115   : > { %v374_v48 = vpop.f32.mrf.mxu0  ;;  %v422_v49 = vpop.f32.mrf.mxu1 }
 0x116   : > { %v469_v50 = vmul.f32 0.5, %v374_v48  ;;  %v485_v51 = vmul.f32 0.5, %v422_v49 }
 0x117   : > { %v376_v52 = vpop.f32.mrf.mxu0  ;;  %v424_v53 = vpop.f32.mrf.mxu1 }
 0x118   : > { %926 = vtanh.f32 %v469_v50  ;;  %v470_v54 = vmul.f32 0.5, %v376_v52  ;;  %v486_v55 = vmul.f32 0.5, %v424_v53 }
 0x119   : > { %928 = vtanh.f32 %v485_v51  ;;  %v380_v56 = vpop.f32.mrf.mxu0  ;;  %v428_v57 = vpop.f32.mrf.mxu1 }
 0x11a   : > { %930 = vtanh.f32 %v470_v54  ;;  %v471_v58 = vmul.f32 0.5, %v380_v56  ;;  %v487_v59 = vmul.f32 0.5, %v428_v57 }
 0x11b   : > { %932 = vtanh.f32 %v486_v55  ;;  %v382_v60 = vpop.f32.mrf.mxu0  ;;  %v430_v61 = vpop.f32.mrf.mxu1 }
 0x11c   : > { %934 = vtanh.f32 %v471_v58  ;;  %v472_v62 = vmul.f32 0.5, %v382_v60  ;;  %v488_v63 = vmul.f32 0.5, %v430_v61 }
 0x11d   : > { %936 = vtanh.f32 %v487_v59  ;;  %v386_v0 = vpop.f32.mrf.mxu0  ;;  %v434_v1 = vpop.f32.mrf.mxu1 }
 0x11e   : > { %938 = vtanh.f32 %v472_v62  ;;  %v473_v2 = vmul.f32 0.5, %v386_v0  ;;  %v489_v3 = vmul.f32 0.5, %v434_v1 }
 0x11f   : > { %940 = vtanh.f32 %v488_v63  ;;  %v388_v4 = vpop.f32.mrf.mxu0  ;;  %v436_v5 = vpop.f32.mrf.mxu1 }
 0x120   : > { %942 = vtanh.f32 %v473_v2  ;;  %v474_v6 = vmul.f32 0.5, %v388_v4  ;;  %v490_v7 = vmul.f32 0.5, %v436_v5 }
 0x121   : > { %944 = vtanh.f32 %v489_v3  ;;  %v392_v8 = vpop.f32.mrf.mxu0  ;;  %v440_v9 = vpop.f32.mrf.mxu1 }
 0x122   : > { %946 = vtanh.f32 %v474_v6  ;;  %v475_v10 = vmul.f32 0.5, %v392_v8  ;;  %v491_v11 = vmul.f32 0.5, %v440_v9 }
 0x123   : > { %948 = vtanh.f32 %v490_v7  ;;  %v394_v12 = vpop.f32.mrf.mxu0  ;;  %v442_v13 = vpop.f32.mrf.mxu1 }
 0x124   : > { %950 = vtanh.f32 %v475_v10  ;;  %v476_v14 = vmul.f32 0.5, %v394_v12  ;;  %v492_v15 = vmul.f32 0.5, %v442_v13 }
 0x125   : > { %v927_v16 = vpop.eup %926  ;;  %952 = vtanh.f32 %v491_v11  ;;  %v398_v17 = vpop.f32.mrf.mxu0 }
 0x126   : > { %v446_v18 = vpop.f32.mrf.mxu1  ;;  %v929_v19 = vpop.eup %928  ;;  %v533_v20 = vmul.f32 0.5, %v927_v16  ;;  %954 = vtanh.f32 %v476_v14  ;;  %v477_v21 = vmul.f32 0.5, %v398_v17 }
 0x127   : > { %v493_v22 = vmul.f32 0.5, %v446_v18  ;;  %v931_v23 = vpop.eup %930  ;;  %v549_v24 = vmul.f32 0.5, %v929_v19  ;;  %956 = vtanh.f32 %v492_v15  ;;  %v400_v25 = vpop.f32.mrf.mxu0 }
 0x128   : > { %v448_v26 = vpop.f32.mrf.mxu1  ;;  %v933_v27 = vpop.eup %932  ;;  %v565_v28 = vadd.f32 0.5, %v533_v20  ;;  %v534_v29 = vmul.f32 0.5, %v931_v23  ;;  %958 = vtanh.f32 %v477_v21  ;;  %v478_v30 = vmul.f32 0.5, %v400_v25 }
 0x129   : > { %v935_v31 = vpop.eup %934  ;;  %v581_v32 = vadd.f32 0.5, %v549_v24  ;;  %v550_v33 = vmul.f32 0.5, %v933_v27  ;;  %960 = vtanh.f32 %v493_v22  ;;  %v494_v34 = vmul.f32 0.5, %v448_v26  ;;  %v404_v35 = vpop.f32.mrf.mxu0 }
 0x12a   : > { %v452_v36 = vpop.f32.mrf.mxu1  ;;  %v937_v37 = vpop.eup %936  ;;  %597 = vst [vmem:[%s1364_s5] sm:$0xff] %v565_v28  ;;  %v566_v38 = vadd.f32 0.5, %v534_v29  ;;  %v535_v39 = vmul.f32 0.5, %v935_v31  ;;  %962 = vtanh.f32 %v478_v30  ;;  %v479_v40 = vmul.f32 0.5, %v404_v35 }
 0x12b   : > { %v939_v41 = vpop.eup %938  ;;  %613 = vst [vmem:[%s1364_s5 + $0x80] sm:$0xff] %v581_v32  ;;  %v582_v42 = vadd.f32 0.5, %v550_v33  ;;  %v551_v43 = vmul.f32 0.5, %v937_v37  ;;  %964 = vtanh.f32 %v494_v34  ;;  %v495_v44 = vmul.f32 0.5, %v452_v36  ;;  %v406_v45 = vpop.f32.mrf.mxu0 }
 0x12c   : > { %v454_v46 = vpop.f32.mrf.mxu1  ;;  %v941_v47 = vpop.eup %940  ;;  %598 = vst [vmem:[%s1364_s5 + $0x8] sm:$0xff] %v566_v38  ;;  %v567_v48 = vadd.f32 0.5, %v535_v39  ;;  %v536_v49 = vmul.f32 0.5, %v939_v41  ;;  %966 = vtanh.f32 %v479_v40  ;;  %v480_v50 = vmul.f32 0.5, %v406_v45 }
 0x12d   : > { %v943_v51 = vpop.eup %942  ;;  %614 = vst [vmem:[%s1364_s5 + $0x88] sm:$0xff] %v582_v42  ;;  %v583_v52 = vadd.f32 0.5, %v551_v43  ;;  %v552_v53 = vmul.f32 0.5, %v941_v47  ;;  %968 = vtanh.f32 %v495_v44  ;;  %v496_v54 = vmul.f32 0.5, %v454_v46  ;;  %v410_v55 = vpop.f32.mrf.mxu0 }
 0x12e   : > { %v458_v56 = vpop.f32.mrf.mxu1  ;;  %v945_v57 = vpop.eup %944  ;;  %599 = vst [vmem:[%s1364_s5 + $0x10] sm:$0xff] %v567_v48  ;;  %v568_v58 = vadd.f32 0.5, %v536_v49  ;;  %v537_v59 = vmul.f32 0.5, %v943_v51  ;;  %970 = vtanh.f32 %v480_v50  ;;  %v481_v60 = vmul.f32 0.5, %v410_v55 }
 0x12f   : > { %v947_v61 = vpop.eup %946  ;;  %615 = vst [vmem:[%s1364_s5 + $0x90] sm:$0xff] %v583_v52  ;;  %v584_v62 = vadd.f32 0.5, %v552_v53  ;;  %v553_v63 = vmul.f32 0.5, %v945_v57  ;;  %972 = vtanh.f32 %v496_v54  ;;  %v497_v0 = vmul.f32 0.5, %v458_v56  ;;  %v412_v1 = vpop.f32.mrf.mxu0 }
 0x130   : > { %v460_v2 = vpop.f32.mrf.mxu1  ;;  %v949_v3 = vpop.eup %948  ;;  %600 = vst [vmem:[%s1364_s5 + $0x18] sm:$0xff] %v568_v58  ;;  %v569_v4 = vadd.f32 0.5, %v537_v59  ;;  %v538_v5 = vmul.f32 0.5, %v947_v61  ;;  %974 = vtanh.f32 %v481_v60  ;;  %v482_v6 = vmul.f32 0.5, %v412_v1 }
 0x131   : > { %v951_v7 = vpop.eup %950  ;;  %616 = vst [vmem:[%s1364_s5 + $0x98] sm:$0xff] %v584_v62  ;;  %v585_v8 = vadd.f32 0.5, %v553_v63  ;;  %v554_v9 = vmul.f32 0.5, %v949_v3  ;;  %976 = vtanh.f32 %v497_v0  ;;  %v498_v10 = vmul.f32 0.5, %v460_v2  ;;  %v416_v11 = vpop.f32.mrf.mxu0 }
 0x132   : > { %v464_v12 = vpop.f32.mrf.mxu1  ;;  %v953_v13 = vpop.eup %952  ;;  %601 = vst [vmem:[%s1364_s5 + $0x20] sm:$0xff] %v569_v4  ;;  %v570_v14 = vadd.f32 0.5, %v538_v5  ;;  %v539_v15 = vmul.f32 0.5, %v951_v7  ;;  %978 = vtanh.f32 %v482_v6  ;;  %v483_v16 = vmul.f32 0.5, %v416_v11 }
 0x133   : > { %v955_v17 = vpop.eup %954  ;;  %617 = vst [vmem:[%s1364_s5 + $0xa0] sm:$0xff] %v585_v8  ;;  %v586_v18 = vadd.f32 0.5, %v554_v9  ;;  %v555_v19 = vmul.f32 0.5, %v953_v13  ;;  %980 = vtanh.f32 %v498_v10  ;;  %v499_v20 = vmul.f32 0.5, %v464_v12  ;;  %v418_v21 = vpop.f32.mrf.mxu0 }
 0x134   : > { %v466_v22 = vpop.f32.mrf.mxu1  ;;  %v957_v23 = vpop.eup %956  ;;  %602 = vst [vmem:[%s1364_s5 + $0x28] sm:$0xff] %v570_v14  ;;  %v571_v24 = vadd.f32 0.5, %v539_v15  ;;  %v540_v25 = vmul.f32 0.5, %v955_v17  ;;  %982 = vtanh.f32 %v483_v16  ;;  %v484_v26 = vmul.f32 0.5, %v418_v21 }
 0x135   : > { %v959_v27 = vpop.eup %958  ;;  %618 = vst [vmem:[%s1364_s5 + $0xa8] sm:$0xff] %v586_v18  ;;  %v587_v28 = vadd.f32 0.5, %v555_v19  ;;  %v556_v29 = vmul.f32 0.5, %v957_v23  ;;  %984 = vtanh.f32 %v499_v20  ;;  %v500_v30 = vmul.f32 0.5, %v466_v22 }
 0x136   : > { %v961_v31 = vpop.eup %960  ;;  %603 = vst [vmem:[%s1364_s5 + $0x30] sm:$0xff] %v571_v24  ;;  %v572_v32 = vadd.f32 0.5, %v540_v25  ;;  %v541_v33 = vmul.f32 0.5, %v959_v27  ;;  %986 = vtanh.f32 %v484_v26 }
 0x137   : > { %v963_v34 = vpop.eup %962  ;;  %619 = vst [vmem:[%s1364_s5 + $0xb0] sm:$0xff] %v587_v28  ;;  %v588_v35 = vadd.f32 0.5, %v556_v29  ;;  %v557_v36 = vmul.f32 0.5, %v961_v31  ;;  %988 = vtanh.f32 %v500_v30 }
 0x138   : > { %v965_v37 = vpop.eup %964  ;;  %604 = vst [vmem:[%s1364_s5 + $0x38] sm:$0xff] %v572_v32  ;;  %v573_v38 = vadd.f32 0.5, %v541_v33  ;;  %v542_v39 = vmul.f32 0.5, %v963_v34 }
 0x139   : > { %v967_v40 = vpop.eup %966  ;;  %620 = vst [vmem:[%s1364_s5 + $0xb8] sm:$0xff] %v588_v35  ;;  %v589_v41 = vadd.f32 0.5, %v557_v36  ;;  %v558_v42 = vmul.f32 0.5, %v965_v37 }
 0x13a   : > { %v969_v43 = vpop.eup %968  ;;  %605 = vst [vmem:[%s1364_s5 + $0x40] sm:$0xff] %v573_v38  ;;  %v574_v44 = vadd.f32 0.5, %v542_v39  ;;  %v543_v45 = vmul.f32 0.5, %v967_v40 }
 0x13b   : > { %v971_v46 = vpop.eup %970  ;;  %621 = vst [vmem:[%s1364_s5 + $0xc0] sm:$0xff] %v589_v41  ;;  %v590_v47 = vadd.f32 0.5, %v558_v42  ;;  %v559_v48 = vmul.f32 0.5, %v969_v43 }
 0x13c   : > { %v973_v49 = vpop.eup %972  ;;  %606 = vst [vmem:[%s1364_s5 + $0x48] sm:$0xff] %v574_v44  ;;  %v575_v50 = vadd.f32 0.5, %v543_v45  ;;  %v544_v51 = vmul.f32 0.5, %v971_v46 }
 0x13d   : > { %v975_v52 = vpop.eup %974  ;;  %622 = vst [vmem:[%s1364_s5 + $0xc8] sm:$0xff] %v590_v47  ;;  %v591_v53 = vadd.f32 0.5, %v559_v48  ;;  %v560_v54 = vmul.f32 0.5, %v973_v49 }
 0x13e   : > { %v977_v55 = vpop.eup %976  ;;  %607 = vst [vmem:[%s1364_s5 + $0x50] sm:$0xff] %v575_v50  ;;  %v576_v56 = vadd.f32 0.5, %v544_v51  ;;  %v545_v57 = vmul.f32 0.5, %v975_v52 }
 0x13f   : > { %v979_v58 = vpop.eup %978  ;;  %623 = vst [vmem:[%s1364_s5 + $0xd0] sm:$0xff] %v591_v53  ;;  %v592_v59 = vadd.f32 0.5, %v560_v54  ;;  %v561_v60 = vmul.f32 0.5, %v977_v55 }
 0x140   : > { %v981_v61 = vpop.eup %980  ;;  %608 = vst [vmem:[%s1364_s5 + $0x58] sm:$0xff] %v576_v56  ;;  %v577_v62 = vadd.f32 0.5, %v545_v57  ;;  %v546_v63 = vmul.f32 0.5, %v979_v58 }
 0x141   : > { %v983_v0 = vpop.eup %982  ;;  %624 = vst [vmem:[%s1364_s5 + $0xd8] sm:$0xff] %v592_v59  ;;  %v593_v1 = vadd.f32 0.5, %v561_v60  ;;  %v562_v2 = vmul.f32 0.5, %v981_v61 }
 0x142   : > { %v985_v3 = vpop.eup %984  ;;  %609 = vst [vmem:[%s1364_s5 + $0x60] sm:$0xff] %v577_v62  ;;  %v578_v4 = vadd.f32 0.5, %v546_v63  ;;  %v547_v5 = vmul.f32 0.5, %v983_v0 }
 0x143   : > { %v987_v6 = vpop.eup %986  ;;  %625 = vst [vmem:[%s1364_s5 + $0xe0] sm:$0xff] %v593_v1  ;;  %v594_v7 = vadd.f32 0.5, %v562_v2  ;;  %v563_v8 = vmul.f32 0.5, %v985_v3 }
 0x144   : > { %v989_v9 = vpop.eup %988  ;;  %610 = vst [vmem:[%s1364_s5 + $0x68] sm:$0xff] %v578_v4  ;;  %v579_v10 = vadd.f32 0.5, %v547_v5  ;;  %v548_v11 = vmul.f32 0.5, %v987_v6 }
 0x145   : > { %626 = vst [vmem:[%s1364_s5 + $0xe8] sm:$0xff] %v594_v7  ;;  %v595_v12 = vadd.f32 0.5, %v563_v8  ;;  %v564_v13 = vmul.f32 0.5, %v989_v9 }
 0x146   : > { %611 = vst [vmem:[%s1364_s5 + $0x70] sm:$0xff] %v579_v10  ;;  %v580_v14 = vadd.f32 0.5, %v548_v11 }
 0x147   : > { %627 = vst [vmem:[%s1364_s5 + $0xf0] sm:$0xff] %v595_v12  ;;  %v596_v15 = vadd.f32 0.5, %v564_v13 }
 0x148   : > { %612 = vst [vmem:[%s1364_s5 + $0x78] sm:$0xff] %v580_v14 }
 0x149   : > { %628 = vst [vmem:[%s1364_s5 + $0xf8] sm:$0xff] %v596_v15 }
 0x14a   : > { %1003 = shalt.err (!%p1000_p3)
}
 0x14b   : > { %s1004_s26 = scalar_lea.hbm %s1400_s21, 4096  ;;  %s1008_s29 = scalar_lea.hbm %s1455_s1, 8192 }
 0x14c   : > { %p1005_p5 = scmp.ne.s32.totalorder %s1400_s21, %s1004_s26  ;;  %p1009_p9 = scmp.lt.s32.totalorder %s1400_s21, %s1455_s1 }
 0x14d   : > { %p1010_p10 = scmp.lt.s32.totalorder %s1008_s29, %s1004_s26 }
 0x14e   : > { %p1006_p6 = pnand %p1005_p5, %p1121_p4 }
 0x14f   : > { %p1011_p11 = por %p1010_p10, %p1009_p9 }
 0x150   : > { %p1007_p7 = pneg %p1006_p6 }
 0x152   : > { %p1012_p12 = pnand %p1011_p11, %p1007_p7 }
 0x154   : > { %1015 = shalt.err (!%p1012_p12)
}
 0x155   : > { %s1069_s3 = smov 256   ;;  %s1070_s12 = smov 16  }
 0x156   : > { %869 = dma.vmem_to_hbm [thread:$0]  (%p1121_p4), %s1402_s15, 4096, %s1400_s21, %s1409_s9, %s1069_s3, %s1069_s3, %s1070_s12  }
 0x157 PF: > { %p875_p13 = scmp.ge.s32.totalorder %s1066_s11, 2  ;;  %s661_s4 = sand.u32 1, %s1046_s6  }
 0x158   : > { %s662_s5 = scalar_lea.sflag [#allocation3], %s661_s4 }
 0x159   : > { %p872_p0 = pnand %p875_p13, %p1128_p8 }
 0x15b   : > { %p873_p1 = pneg %p872_p0 }
 0x15d   : > { %1041 = dma.done.wait (%p873_p1), %s662_s5, 4096  }
 0x15e   : > { %1043 = vsyncadd (%p873_p1), %s662_s5, 4294963200  ;;  %s14_s11 = sadd.s32 1, %s1066_s11   ;;  %s1458_s6 = smov %s1050_s7 }
 0x15f   : > { %p11_p2 = scmp.ge.s32.totalorder %s14_s11, 4   ;;  %s1459_s7 = smov %s1054_s8 }
 0x160   : > { %s1460_s8 = smov %s1134_s19  ;;  %s1461_s9 = smov %s1062_s10 }
 0x161   : > { %s1462_s10 = smov %s1464_s14  ;;  %13 = sbr.rel (!%p11_p2) target bundleno = 4 (0x4), region = 58 }
 0x166   :  { %667 = vsyncpa [#allocation3], 1 }
 0x167   :  { %669 = vsyncpa [#allocation3 + $0x1], 1 }

</bundles_post_ra>
